<compile_context>
chip_gen: v7x
topology: tpu7x:2x2x1
jax: 0.10.0
libtpu: 0.0.40
codegen_flags: <defaults>
</compile_context>

<pallas_src>
import jax
import jax.numpy as jnp
from jax.experimental import pallas as pl
from jax.experimental.pallas import tpu as pltpu

BN_EPS = 1e-5


def _conv1x1(w_ref, x_ref):
    """(Cout, Cin) @ (Cin, T) -> (Cout, T) in fp32."""
    cin = x_ref.shape[0]
    if cin <= 16:
        # Tiny contraction: unrolled VPU FMAs (outer-product broadcasts).
        # Avoids MXU push/pop overhead for a K=Cin sliver (matters on v5e).
        w = w_ref[...].astype(jnp.float32)
        x = x_ref[...].astype(jnp.float32)
        z = w[:, 0:1] * x[0:1, :]
        for k in range(1, cin):
            z = z + w[:, k:k + 1] * x[k:k + 1, :]
        return z
    return jnp.dot(w_ref[...], x_ref[...], preferred_element_type=jnp.float32)


def _stats_kernel(w_ref, x_ref, sum_ref, sumsq_ref, acc_s, acc_ss):
    """Pass 1: accumulate per-channel sum / sum-of-squares of u = W x.

    The conv bias is omitted: a per-channel constant is removed exactly by
    batch-norm, so it never affects the output (handled in the finalize).
    Partial sums are kept lane-wide in VMEM scratch (cheap VPU adds per tile);
    the XLU lane reduction happens once, on the last grid step.
    """
    first = (pl.program_id(0) == 0) & (pl.program_id(1) == 0)
    last = ((pl.program_id(0) == pl.num_programs(0) - 1)
            & (pl.program_id(1) == pl.num_programs(1) - 1))

    @pl.when(first)
    def _():
        acc_s[...] = jnp.zeros_like(acc_s)
        acc_ss[...] = jnp.zeros_like(acc_ss)

    # x_ref: (Cin, T)  w_ref: (Cout, Cin)
    u = _conv1x1(w_ref, x_ref)              # (Cout, T)
    acc_s[...] += u
    acc_ss[...] += u * u

    @pl.when(last)
    def _():
        sum_ref[...] = jnp.sum(acc_s[...], axis=1, keepdims=True)     # (Cout,1)
        sumsq_ref[...] = jnp.sum(acc_ss[...], axis=1, keepdims=True)  # (Cout,1)


def _apply_kernel(w_ref, shift_ref, x_ref, y_ref, o_ref):
    """Pass 2: out = relu(w_eff @ x + shift + y).  BN folded into w/shift."""
    z = _conv1x1(w_ref, x_ref) + shift_ref[...] + y_ref[...]
    o_ref[...] = jnp.maximum(z, 0.0).astype(o_ref.dtype)


def _pick_hw_tile(hw, max_tile=4096):
    """Largest lane tile <= max_tile that exactly divides hw (128-multiple),
    falling back to the full extent (always legal as a block dim)."""
    if hw <= max_tile:
        return hw
    if hw % 128 == 0:
        t = max_tile - (max_tile % 128)
        while t >= 128:
            if hw % t == 0:
                return t
            t -= 128
    return hw


def fusion_block_pallas(x_nchw, y_nchw, w_conv, b_conv, gamma, beta):
    """x_nchw: (N, Cin, H, W), y_nchw: (N, 2*Cin, H, W) -> (N, 2*Cin, H, W)."""
    n, cin, h, wd = x_nchw.shape
    cout = w_conv.shape[0]
    assert y_nchw.shape == (n, cout, h, wd)

    hw = h * wd
    m_total = n * hw
    t_hw = _pick_hw_tile(hw)
    assert hw % t_hw == 0  # no padded lanes -> BN stats stay exact
    grid = (n, hw // t_hw)

    # Free reshapes: keep native NCHW, just flatten the spatial dims.
    x3 = x_nchw.reshape(n, cin, hw)
    y3 = y_nchw.reshape(n, cout, hw)

    w_mat = w_conv.reshape(cout, cin).astype(jnp.float32)   # (Cout, Cin)
    b_col = b_conv.reshape(cout, 1).astype(jnp.float32)     # (Cout, 1), unused
    del b_col  # conv bias cancels exactly under training-mode batch-norm

    x_spec = pl.BlockSpec((None, cin, t_hw), lambda bn, bt: (bn, 0, bt))
    y_spec = pl.BlockSpec((None, cout, t_hw), lambda bn, bt: (bn, 0, bt))
    w_spec = pl.BlockSpec((cout, cin), lambda bn, bt: (0, 0))
    col_spec = pl.BlockSpec((cout, 1), lambda bn, bt: (0, 0))

    # ---- Pass 1: global BN batch statistics over N*H*W -------------------
    sum_u, sumsq_u = pl.pallas_call(
        _stats_kernel,
        grid=grid,
        in_specs=[w_spec, x_spec],
        out_specs=[col_spec, col_spec],
        out_shape=[jax.ShapeDtypeStruct((cout, 1), jnp.float32),
                   jax.ShapeDtypeStruct((cout, 1), jnp.float32)],
        scratch_shapes=[pltpu.VMEM((cout, t_hw), jnp.float32),
                        pltpu.VMEM((cout, t_hw), jnp.float32)],
        compiler_params=pltpu.CompilerParams(
            dimension_semantics=("arbitrary", "arbitrary")),
        cost_estimate=pl.CostEstimate(
            flops=2 * m_total * cin * cout + 3 * m_total * cout,
            transcendentals=0,
            bytes_accessed=4 * m_total * cin),
    )(w_mat, x3)

    # ---- Finalize (tiny per-channel math, plain JAX): fold BN into conv ---
    mean_u = sum_u / m_total                                  # (Cout, 1)
    var = sumsq_u / m_total - mean_u * mean_u                 # biased variance
    scale = gamma.reshape(cout, 1) * jax.lax.rsqrt(var + BN_EPS)
    # shift = beta + scale*(b - mean_z) with mean_z = mean_u + b  ==>  b cancels
    shift = beta.reshape(cout, 1) - scale * mean_u            # (Cout, 1)
    w_eff = w_mat * scale                                     # (Cout, Cin)

    # ---- Pass 2: out = relu(w_eff @ x + shift + y) ------------------------
    out3 = pl.pallas_call(
        _apply_kernel,
        grid=grid,
        in_specs=[w_spec, col_spec, x_spec, y_spec],
        out_specs=y_spec,
        out_shape=jax.ShapeDtypeStruct((n, cout, hw), x_nchw.dtype),
        compiler_params=pltpu.CompilerParams(
            dimension_semantics=("parallel", "parallel")),
        cost_estimate=pl.CostEstimate(
            flops=2 * m_total * cin * cout + 3 * m_total * cout,
            transcendentals=0,
            bytes_accessed=4 * m_total * (cin + 2 * cout)),
    )(w_eff, shift, x3, y3)

    return out3.reshape(n, cout, h, wd)


def _reference(x_nchw, y_nchw, w_conv, b_conv, gamma, beta):
    n, cin, h, wd = x_nchw.shape
    cout = w_conv.shape[0]
    x_flat = jnp.transpose(x_nchw, (0, 2, 3, 1)).reshape(-1, cin)
    z = x_flat @ w_conv.reshape(cout, cin).T + b_conv[None, :]
    mean = z.mean(axis=0, keepdims=True)
    var = ((z - mean) ** 2).mean(axis=0, keepdims=True)
    z = gamma[None, :] * (z - mean) / jnp.sqrt(var + BN_EPS) + beta[None, :]
    y_flat = jnp.transpose(y_nchw, (0, 2, 3, 1)).reshape(-1, cout)
    out = jnp.maximum(z + y_flat, 0.0)
    return jnp.transpose(out.reshape(n, h, wd, cout), (0, 3, 1, 2))


if __name__ == "__main__":
    in_plane = 4
    N, H, W = 2, 16, 16
    cout = in_plane * 2

    key = jax.random.PRNGKey(0)
    kx, ky, kw, kb, kg, kbe = jax.random.split(key, 6)

    x = jax.random.normal(kx, (N, in_plane, H, W), dtype=jnp.float32)
    y = jax.random.normal(ky, (N, cout, H, W), dtype=jnp.float32)

    # Deterministic synthetic parameters (shapes per nn.Conv2d / nn.BatchNorm2d).
    w_conv = jax.random.normal(kw, (cout, in_plane, 1, 1), dtype=jnp.float32) * 0.1
    b_conv = jax.random.normal(kb, (cout,), dtype=jnp.float32) * 0.1
    gamma = 1.0 + 0.1 * jax.random.normal(kg, (cout,), dtype=jnp.float32)
    beta = 0.1 * jax.random.normal(kbe, (cout,), dtype=jnp.float32)

    out = fusion_block_pallas(x, y, w_conv, b_conv, gamma, beta)
    jax.block_until_ready(out)

    ref = _reference(x, y, w_conv, b_conv, gamma, beta)
    assert out.shape == (N, cout, H, W)
    assert jnp.allclose(out, ref, atol=1e-4, rtol=1e-4), (
        float(jnp.max(jnp.abs(out - ref))))

    print("KERNEL_OK")
</pallas_src>

<mosaic_0001>
module attributes {stable_mosaic.version = 11 : i64} {
  func.func @_stats_kernel(%arg0: i32, %arg1: i32, %arg2: memref<8x4xf32, #tpu.memory_space<vmem>>, %arg3: memref<1x4x256xf32, #tpu.memory_space<vmem>>, %arg4: memref<8x1xf32, #tpu.memory_space<vmem>>, %arg5: memref<8x1xf32, #tpu.memory_space<vmem>>, %arg6: memref<8x256xf32, #tpu.memory_space<vmem>>, %arg7: memref<8x256xf32, #tpu.memory_space<vmem>>) attributes {dimension_semantics = [#tpu.dimension_semantics<arbitrary>, #tpu.dimension_semantics<arbitrary>], iteration_bounds = array<i64: 2, 1>, scalar_prefetch = 0 : i64, scratch_operands = 2 : i64, tpu.core_type = #tpu.core_type<tc>, window_params = [{pipeline_mode = #tpu.pipeline_mode<synchronous>, transform_indices = @transform_0, window_bounds = array<i64: 8, 4>}, {transform_indices = @transform_1, window_bounds = array<i64: 1, 4, 256>}, {pipeline_mode = #tpu.pipeline_mode<synchronous>, transform_indices = @transform_2, window_bounds = array<i64: 8, 1>}, {pipeline_mode = #tpu.pipeline_mode<synchronous>, transform_indices = @transform_3, window_bounds = array<i64: 8, 1>}]} {
    %c0_i32 = arith.constant 0 : i32
    %0 = arith.cmpi eq, %arg0, %c0_i32 : i32
    %c0_i32_0 = arith.constant 0 : i32
    %1 = arith.cmpi eq, %arg1, %c0_i32_0 : i32
    %2 = arith.andi %0, %1 : i1
    %c1_i32 = arith.constant 1 : i32
    %3 = arith.cmpi eq, %arg0, %c1_i32 : i32
    %c0_i32_1 = arith.constant 0 : i32
    %4 = arith.cmpi eq, %arg1, %c0_i32_1 : i32
    %5 = arith.andi %3, %4 : i1
    %6 = arith.extui %2 : i1 to i32
    %c0_i32_2 = arith.constant 0 : i32
    %7 = arith.cmpi ne, %6, %c0_i32_2 : i32
    scf.if %7 {
      %cst = arith.constant 0.000000e+00 : f32
      %43 = vector.broadcast %cst : f32 to vector<8x256xf32>
      %c0_16 = arith.constant 0 : index
      %c0_17 = arith.constant 0 : index
      %44 = vector.load %arg6[%c0_16, %c0_17] : memref<8x256xf32, #tpu.memory_space<vmem>>, vector<8x256xf32>
      tpu.vector_store %arg6[%c0_16, %c0_17], %43 {strides = array<i32>} : memref<8x256xf32, #tpu.memory_space<vmem>>, vector<8x256xf32>,
      %cst_18 = arith.constant 0.000000e+00 : f32
      %45 = vector.broadcast %cst_18 : f32 to vector<8x256xf32>
      %c0_19 = arith.constant 0 : index
      %c0_20 = arith.constant 0 : index
      %46 = vector.load %arg7[%c0_19, %c0_20] : memref<8x256xf32, #tpu.memory_space<vmem>>, vector<8x256xf32>
      tpu.vector_store %arg7[%c0_19, %c0_20], %45 {strides = array<i32>} : memref<8x256xf32, #tpu.memory_space<vmem>>, vector<8x256xf32>,
    } else {
    }
    %c0 = arith.constant 0 : index
    %c0_3 = arith.constant 0 : index
    %8 = vector.load %arg2[%c0, %c0_3] : memref<8x4xf32, #tpu.memory_space<vmem>>, vector<8x4xf32>
    %c0_4 = arith.constant 0 : index
    %c0_5 = arith.constant 0 : index
    %c0_6 = arith.constant 0 : index
    %9 = vector.load %arg3[%c0_4, %c0_5, %c0_6] : memref<1x4x256xf32, #tpu.memory_space<vmem>>, vector<1x4x256xf32>
    %10 = vector.shape_cast %9 : vector<1x4x256xf32> to vector<4x256xf32>
    %11 = vector.extract_strided_slice %8 {offsets = [0, 0], sizes = [8, 1], strides = [1, 1]} : vector<8x4xf32> to vector<8x1xf32>
    %12 = vector.extract_strided_slice %10 {offsets = [0, 0], sizes = [1, 256], strides = [1, 1]} : vector<4x256xf32> to vector<1x256xf32>
    %13 = vector.broadcast %11 : vector<8x1xf32> to vector<8x256xf32>
    %14 = vector.broadcast %12 : vector<1x256xf32> to vector<8x256xf32>
    %15 = arith.mulf %13, %14 : vector<8x256xf32>
    %16 = vector.extract_strided_slice %8 {offsets = [0, 1], sizes = [8, 1], strides = [1, 1]} : vector<8x4xf32> to vector<8x1xf32>
    %17 = vector.extract_strided_slice %10 {offsets = [1, 0], sizes = [1, 256], strides = [1, 1]} : vector<4x256xf32> to vector<1x256xf32>
    %18 = vector.broadcast %16 : vector<8x1xf32> to vector<8x256xf32>
    %19 = vector.broadcast %17 : vector<1x256xf32> to vector<8x256xf32>
    %20 = arith.mulf %18, %19 : vector<8x256xf32>
    %21 = arith.addf %15, %20 : vector<8x256xf32>
    %22 = vector.extract_strided_slice %8 {offsets = [0, 2], sizes = [8, 1], strides = [1, 1]} : vector<8x4xf32> to vector<8x1xf32>
    %23 = vector.extract_strided_slice %10 {offsets = [2, 0], sizes = [1, 256], strides = [1, 1]} : vector<4x256xf32> to vector<1x256xf32>
    %24 = vector.broadcast %22 : vector<8x1xf32> to vector<8x256xf32>
    %25 = vector.broadcast %23 : vector<1x256xf32> to vector<8x256xf32>
    %26 = arith.mulf %24, %25 : vector<8x256xf32>
    %27 = arith.addf %21, %26 : vector<8x256xf32>
    %28 = vector.extract_strided_slice %8 {offsets = [0, 3], sizes = [8, 1], strides = [1, 1]} : vector<8x4xf32> to vector<8x1xf32>
    %29 = vector.extract_strided_slice %10 {offsets = [3, 0], sizes = [1, 256], strides = [1, 1]} : vector<4x256xf32> to vector<1x256xf32>
    %30 = vector.broadcast %28 : vector<8x1xf32> to vector<8x256xf32>
    %31 = vector.broadcast %29 : vector<1x256xf32> to vector<8x256xf32>
    %32 = arith.mulf %30, %31 : vector<8x256xf32>
    %33 = arith.addf %27, %32 : vector<8x256xf32>
    %c0_7 = arith.constant 0 : index
    %c0_8 = arith.constant 0 : index
    %34 = vector.load %arg6[%c0_7, %c0_8] : memref<8x256xf32, #tpu.memory_space<vmem>>, vector<8x256xf32>
    %35 = arith.addf %34, %33 : vector<8x256xf32>
    %c0_9 = arith.constant 0 : index
    %c0_10 = arith.constant 0 : index
    %36 = vector.load %arg6[%c0_9, %c0_10] : memref<8x256xf32, #tpu.memory_space<vmem>>, vector<8x256xf32>
    tpu.vector_store %arg6[%c0_9, %c0_10], %35 {strides = array<i32>} : memref<8x256xf32, #tpu.memory_space<vmem>>, vector<8x256xf32>,
    %c0_11 = arith.constant 0 : index
    %c0_12 = arith.constant 0 : index
    %37 = vector.load %arg7[%c0_11, %c0_12] : memref<8x256xf32, #tpu.memory_space<vmem>>, vector<8x256xf32>
    %38 = arith.mulf %33, %33 : vector<8x256xf32>
    %39 = arith.addf %37, %38 : vector<8x256xf32>
    %c0_13 = arith.constant 0 : index
    %c0_14 = arith.constant 0 : index
    %40 = vector.load %arg7[%c0_13, %c0_14] : memref<8x256xf32, #tpu.memory_space<vmem>>, vector<8x256xf32>
    tpu.vector_store %arg7[%c0_13, %c0_14], %39 {strides = array<i32>} : memref<8x256xf32, #tpu.memory_space<vmem>>, vector<8x256xf32>,
    %41 = arith.extui %5 : i1 to i32
    %c0_i32_15 = arith.constant 0 : i32
    %42 = arith.cmpi ne, %41, %c0_i32_15 : i32
    scf.if %42 {
      %c0_16 = arith.constant 0 : index
      %c0_17 = arith.constant 0 : index
      %43 = vector.load %arg6[%c0_16, %c0_17] : memref<8x256xf32, #tpu.memory_space<vmem>>, vector<8x256xf32>
      %cst = arith.constant dense<0.000000e+00> : vector<8xf32>
      %44 = vector.multi_reduction <add>, %43, %cst [1] : vector<8x256xf32> to vector<8xf32>
      %45 = vector.shape_cast %44 : vector<8xf32> to vector<8x1xf32>
      %c0_18 = arith.constant 0 : index
      %c0_19 = arith.constant 0 : index
      %46 = vector.load %arg4[%c0_18, %c0_19] : memref<8x1xf32, #tpu.memory_space<vmem>>, vector<8x1xf32>
      tpu.vector_store %arg4[%c0_18, %c0_19], %45 {strides = array<i32>} : memref<8x1xf32, #tpu.memory_space<vmem>>, vector<8x1xf32>,
      %c0_20 = arith.constant 0 : index
      %c0_21 = arith.constant 0 : index
      %47 = vector.load %arg7[%c0_20, %c0_21] : memref<8x256xf32, #tpu.memory_space<vmem>>, vector<8x256xf32>
      %cst_22 = arith.constant dense<0.000000e+00> : vector<8xf32>
      %48 = vector.multi_reduction <add>, %47, %cst_22 [1] : vector<8x256xf32> to vector<8xf32>
      %49 = vector.shape_cast %48 : vector<8xf32> to vector<8x1xf32>
      %c0_23 = arith.constant 0 : index
      %c0_24 = arith.constant 0 : index
      %50 = vector.load %arg5[%c0_23, %c0_24] : memref<8x1xf32, #tpu.memory_space<vmem>>, vector<8x1xf32>
      tpu.vector_store %arg5[%c0_23, %c0_24], %49 {strides = array<i32>} : memref<8x1xf32, #tpu.memory_space<vmem>>, vector<8x1xf32>,
    } else {
    }
    return
  }
  func.func @transform_0(%arg0: i32, %arg1: i32) -> (i32, i32) {
    %c0_i32 = arith.constant 0 : i32
    %c0_i32_0 = arith.constant 0 : i32
    %c0_i32_1 = arith.constant 0 : i32
    return %c0_i32, %c0_i32_0 : i32, i32
  }
  func.func @transform_1(%arg0: i32, %arg1: i32) -> (i32, i32, i32) {
    %c0_i32 = arith.constant 0 : i32
    %c0_i32_0 = arith.constant 0 : i32
    return %arg0, %c0_i32, %arg1 : i32, i32, i32
  }
  func.func @transform_2(%arg0: i32, %arg1: i32) -> (i32, i32) {
    %c0_i32 = arith.constant 0 : i32
    %c0_i32_0 = arith.constant 0 : i32
    %c0_i32_1 = arith.constant 0 : i32
    return %c0_i32, %c0_i32_0 : i32, i32
  }
  func.func @transform_3(%arg0: i32, %arg1: i32) -> (i32, i32) {
    %c0_i32 = arith.constant 0 : i32
    %c0_i32_0 = arith.constant 0 : i32
    %c0_i32_1 = arith.constant 0 : i32
    return %c0_i32, %c0_i32_0 : i32, i32
  }
}

</mosaic_0001>

<bundles_post_ra>
// kernel: tpu_custom_call.1
= control target key start
LH: loop header
LB: loop body
LE: loop exit
PB: predicated region body
PF: predicated region fallthrough
CT: control target
= control target key end

     0   :  { %9 = vsyncpa [#allocation5], 0  ;;  %s720_s0 = inlined_call_operand.vmem [shape: f32[8,4], index: 0, kind: input, shape index: {}]   ;;  %s721_s1 = inlined_call_operand.hbm [shape: f32[2,4,256], index: 1, kind: input, shape index: {}]   ;;  %s722_s2 = inlined_call_operand.vmem [shape: f32[8,1], index: 2, kind: output, shape index: {0}]   ;;  %s723_s3 = inlined_call_operand.vmem [shape: f32[8,1], index: 3, kind: output, shape index: {1}]  }
   0x1   :  { %11 = vsyncpa [#allocation5 + $0x1], 0  ;;  %s582_s12 = smov 0   ;;  %s584_s13 = smov 0  }
   0x2   :  { %s586_s14 = smov 0   ;;  %s588_s15 = smov 0  }
   0x3   :  { %s590_s16 = smov 0   ;;  %s592_s17 = smov 0  }
   0x4 LB: > { %s394_s18 = sadd.s32 4294967295, %s554_s17   ;;  %s29_s19 = sadd.s32 1, %s550_s16  ;;  %s554_s17 = sphi %s592_s17, %s17_s17   ;;  %s550_s16 = sphi %s590_s16, %s733_s16   ;;  %s546_s15 = sphi %s588_s15, %s732_s15   ;;  %s542_s14 = sphi %s586_s14, %s731_s14   ;;  %s538_s13 = sphi %s584_s13, %s730_s13   ;;  %s534_s12 = sphi %s582_s12, %s729_s12  }
   0x5   : > { %p31_p0 = scmp.ge.s32.totalorder %s29_s19, 2  ;;  %s59_s20 = sadd.s32 1, %s542_s14 }
   0x6   : > { %p66_p1 = scmp.ne.s32.totalorder %s542_s14, %s538_s13  ;;  %p67_p2 = scmp.eq.s32.totalorder %s554_s17, 0 }
   0x7   : > { %s735_s19 = smov (%p31_p0, %s29_s19), 0  ;;  %p72_p4 = scmp.ne.s32.totalorder %s538_s13, %s534_s12 }
   0x8   : > { %p618_p3 = por %p67_p2, %p66_p1  ;;  %s54_s22 = ssub.s32 %s550_s16, %s735_s19 }
   0x9   : > { %p73_p5 = scmp.eq.s32.totalorder %s394_s18, 0  ;;  %p57_p6 = scmp.eq.s32.totalorder %s54_s22, 0 }
   0xa   : > { %p415_p8 = scmp.lt.s32.totalorder %s554_s17, 2  ;;  %s141_s25 = sand.u32 1, %s542_s14  }
   0xb   : > { %p625_p7 = por %p73_p5, %p72_p4  ;;  %s406_s26 = sshll.u32 %s550_s16, 7 }
   0xc   : > { %s631_s24 = scalar_select %p57_p6, %s542_s14, %s59_s20  }
   0xd   : > { %s397_s27 = sshll.u32 %s141_s25, 3  ;;  %s638_s30 = scalar_lea.hbm %s721_s1, %s406_s26 }
   0xe   : > { %s145_s4 = scalar_lea.vmem [#allocation4], %s397_s27  ;;  %p642_p9 = pnand %p415_p8, %p618_p3 }
   0xf   : > { %s155_s5 = sshll.u32 %s145_s4, 4  ;;  %s142_s7 = scalar_lea.sflag [#allocation5], %s141_s25  ;;  %s646_s5 = int_to_ptr.vmem [resolvable:$true] %s155_s5 }
  0x10   : > { %s474_s8 = scalar_lea.hbm %s638_s30, 128  ;;  %p476_p13 = pneg %p642_p9 }
  0x11   : > { %p475_p12 = scmp.ne.s32.totalorder %s638_s30, %s474_s8  ;;  %s479_s11 = scalar_lea.hbm %s721_s1, 256 }
  0x12   : > { %p480_p2 = scmp.lt.u32.totalorder %s638_s30, %s721_s1  ;;  %p481_p3 = scmp.lt.u32.totalorder %s479_s11, %s474_s8 }
  0x13   : > { %p477_p0 = pnand %p476_p13, %p475_p12  ;;  %p483_p5 = scmp.lt.u32.totalorder %s474_s8, %s638_s30 }
  0x14   : > { %p482_p4 = por %p481_p3, %p480_p2 }
  0x15   : > { %p478_p1 = pneg %p477_p0 }
  0x16   : > { %p484_p6 = por %p483_p5, %p482_p4 }
  0x18   : > { %p485_p8 = pnand %p484_p6, %p478_p1 }
  0x1a   : > { %488 = shalt.err (!%p485_p8)
}
  0x1b   : > { %s489_s20 = scalar_lea.vmem %s646_s5, 128  ;;  %s556_s21 = smov [#allocation4]  }
  0x1c   : > { %p490_p12 = scmp.ne.s32.totalorder %s646_s5, %s489_s20  ;;  %s494_s22 = sshll.u32 %s556_s21, 4  ;;  %s495_s22 = int_to_ptr.vmem [resolvable:$false] %s494_s22 }
  0x1d   : > { %s496_s25 = scalar_lea.vmem %s495_s22, 256  ;;  %p497_p11 = scmp.lt.s32.totalorder %s646_s5, %s495_s22 }
  0x1e   : > { %p492_p0 = pnand %p490_p12, %p476_p13  ;;  %p498_p2 = scmp.lt.s32.totalorder %s496_s25, %s489_s20 }
  0x20   : > { %p493_p10 = pneg %p492_p0  ;;  %p499_p3 = por %p498_p2, %p497_p11 }
  0x22   : > { %p500_p4 = pnand %p499_p3, %p493_p10 }
  0x24   : > { %503 = shalt.err (!%p500_p4)
}
  0x25   : > { %414 = dma.hbm_to_vmem [thread:$0]  (!%p642_p9), %s638_s30, 128, %s646_s5, %s142_s7  }
  0x26   : > { %p727_p1 = scmp.lt.s32.totalorder %s554_s17, 3  ;;  %p728_p5 = scmp.ge.s32.totalorder %s554_s17, 1 }
  0x28   : > { %p161_p13 = pnand %p728_p5, %p727_p1 }
  0x29   : > { %s166_s26 = sand.u32 (!%p161_p13), 1, %s538_s13  }
  0x2a   : > { %164 = sbr.rel (%p161_p13) target bundleno = 361 (0x169), region = 28  ;;  %s680_s27 = sshll.u32 (!%p161_p13), %s166_s26, 3 }
  0x2b   : > { %s167_s28 = scalar_lea.sflag (!%p161_p13), [#allocation5], %s166_s26  ;;  %s170_s29 = scalar_lea.vmem (!%p161_p13), [#allocation4], %s680_s27 }
  0x31   : > { %529 = dma.done.wait (%p625_p7), %s167_s28, 128  }
  0x32   : > { %531 = vsyncadd (%p625_p7), %s167_s28, 4294967168  ;;  %p189_p9 = scmp.eq.s32.totalorder %s546_s15, 0  ;;  %p193_p10 = scmp.eq.s32.totalorder %s546_s15, 1 }
  0x33   : > { %v557_v0 = vmov (%p189_p9), 0.0  }
  0x34   : > { %197 = sbr.rel (!%p189_p9) target bundleno = 59 (0x3b), region = 36  ;;  %198 = vst [vmem:[#allocation2] sm:$0xff] (%p189_p9), %v557_v0  ;;  %199 = vst [vmem:[#allocation2 + $0x8] sm:$0xff] (%p189_p9), %v557_v0 }
  0x35   : > { %200 = vst [vmem:[#allocation3] sm:$0xff] (%p189_p9), %v557_v0  ;;  %201 = vst [vmem:[#allocation3 + $0x8] sm:$0xff] (%p189_p9), %v557_v0 }
  0x3b PF: > { %v202_v1 = vld [vmem:[%s720_s0] sm:$0xff]  ;;  %v558_v2 = vmov 0   ;;  %v559_v3 = vmov 2   ;;  %v560_v4 = vmov 1   ;;  %v561_v5 = vmov 3   ;;  %v309_v50 = vld [vmem:[#allocation2 + $0x8] sm:$0xff] }
  0x3c   : > { %469 = vset.pattern.permute.xlu0 %v558_v2  ;;  %471 = vset.pattern.permute.xlu1 %v559_v3  ;;  %v210_v6 = vlaneseq  ;;  %v203_v12 = vld [vmem:[%s170_s29] sm:$0xff]  ;;  %v314_v53 = vld [vmem:[#allocation3] sm:$0xff]  ;;  %v315_v54 = vld [vmem:[#allocation3 + $0x8] sm:$0xff]  ;;  %vm329_vm0 = vcmask (%p193_p10), 7168  }
  0x3d   : > { %206 = vperm.xlu0 %469, %v202_v1   ;;  %257 = vperm.xlu1 %471, %v202_v1   ;;  %v308_v49 = vld [vmem:[#allocation2] sm:$0xff] }
  0x3e   : > { %v211_v7 = vshrl.u32 %v210_v6, 7 }
  0x40   : > { %v212_v8 = vsub.s32 0, %v211_v7  ;;  %v216_v9 = vsub.s32 4, %v211_v7  ;;  %v236_v10 = vsub.s32 1, %v211_v7  ;;  %v240_v11 = vsub.s32 5, %v211_v7 }
  0x41   : > { %470 = vset.pattern.permute.xlu0 %v560_v4  ;;  %472 = vset.pattern.permute.xlu1 %v561_v5  ;;  %v262_v13 = vsub.s32 2, %v211_v7  ;;  %v266_v14 = vsub.s32 6, %v211_v7  ;;  %v288_v15 = vsub.s32 3, %v211_v7  ;;  %v292_v16 = vsub.s32 7, %v211_v7 }
  0x42   : > { %231 = vperm.xlu0 %470, %v202_v1   ;;  %283 = vperm.xlu1 %472, %v202_v1   ;;  %v213_v17 = vrot.slane %v203_v12, %v212_v8  ;;  %v217_v18 = vrot.slane %v203_v12, %v216_v9  ;;  %v237_v19 = vrot.slane %v203_v12, %v236_v10 }
  0x43   : > { %v241_v20 = vrot.slane %v203_v12, %v240_v11  ;;  %v263_v21 = vrot.slane %v203_v12, %v262_v13  ;;  %v267_v22 = vrot.slane %v203_v12, %v266_v14  ;;  %v289_v25 = vrot.slane %v203_v12, %v288_v15 }
  0x44   : > { %v293_v26 = vrot.slane %v203_v12, %v292_v16  ;;  %v223_v27 = vrot.slane %v213_v17, %v212_v8  ;;  %v227_v28 = vrot.slane %v217_v18, %v212_v8  ;;  %v247_v29 = vrot.slane %v237_v19, %v236_v10 }
  0x45   : > { %v251_v30 = vrot.slane %v241_v20, %v236_v10  ;;  %v273_v31 = vrot.slane %v263_v21, %v262_v13  ;;  %v277_v32 = vrot.slane %v267_v22, %v262_v13  ;;  %v299_v33 = vrot.slane %v289_v25, %v288_v15 }
  0x46   : > { %473 = vset.pattern.permute.xlu0 %v561_v5  ;;  %v303_v34 = vrot.slane %v293_v26, %v288_v15 }
  0xbc   : > { %v207_v23 = vpop.permute.xlu0 %206  ;;  %v258_v24 = vpop.permute.xlu1 %257 }
  0xbd   : > { %v228_v37 = vmul.f32 %v223_v27, %v207_v23  ;;  %v229_v38 = vmul.f32 %v227_v28, %v207_v23  ;;  %v278_v41 = vmul.f32 %v273_v31, %v258_v24  ;;  %v279_v42 = vmul.f32 %v277_v32, %v258_v24 }
  0xc1   : > { %v232_v35 = vpop.permute.xlu0 %231  ;;  %v284_v36 = vpop.permute.xlu1 %283 }
  0xc2   : > { %v252_v39 = vmul.f32 %v247_v29, %v232_v35  ;;  %v253_v40 = vmul.f32 %v251_v30, %v232_v35  ;;  %v304_v45 = vmul.f32 %v299_v33, %v284_v36  ;;  %v305_v46 = vmul.f32 %v303_v34, %v284_v36 }
  0xc4   : > { %v254_v43 = vadd.f32 %v252_v39, %v228_v37  ;;  %v255_v44 = vadd.f32 %v253_v40, %v229_v38 }
  0xc6   : > { %v280_v47 = vadd.f32 %v278_v41, %v254_v43  ;;  %v281_v48 = vadd.f32 %v279_v42, %v255_v44 }
  0xc8   : > { %v306_v51 = vadd.f32 %v304_v45, %v280_v47  ;;  %v307_v52 = vadd.f32 %v305_v46, %v281_v48  ;;  %323 = sbr.rel (!%p193_p10) target bundleno = 361 (0x169), region = 40 }
  0xca   : > { %v310_v55 = vadd.f32 %v308_v49, %v306_v51  ;;  %v311_v56 = vadd.f32 %v309_v50, %v307_v52  ;;  %v316_v57 = vmul.f32 %v306_v51, %v306_v51  ;;  %v317_v58 = vmul.f32 %v307_v52, %v307_v52 }
  0xcc   : > { %312 = vst [vmem:[#allocation2] sm:$0xff] %v310_v55  ;;  %313 = vst [vmem:[#allocation2 + $0x8] sm:$0xff] %v311_v56  ;;  %v318_v59 = vadd.f32 %v316_v57, %v314_v53  ;;  %v319_v60 = vadd.f32 %v317_v58, %v315_v54 }
  0xce   : > { %320 = vst [vmem:[#allocation3] sm:$0xff] %v318_v59  ;;  %321 = vst [vmem:[#allocation3 + $0x8] sm:$0xff] %v319_v60 }
  0xd3   : > { %v324_v61 = vld [vmem:[#allocation2] sm:$0xff]  ;;  %v325_v62 = vld [vmem:[#allocation2 + $0x8] sm:$0xff] }
  0xd4   : > { %v326_v0 = vadd.f32 %v325_v62, %v324_v61 }
  0xd5   : > { %v331_v63 = vld [vmem:[#allocation3] sm:$0xff]  ;;  %v332_v1 = vld [vmem:[#allocation3 + $0x8] sm:$0xff] }
  0xd6   : > { %327 = vadd.xlane.f32.xlu0 %v326_v0  ;;  %v333_v2 = vadd.f32 %v332_v1, %v331_v63 }
  0xda   : > { %334 = vadd.xlane.f32.xlu0 %v333_v2 }
 0x163   : > { %v328_v3 = vpop.xlane.xlu0 %327 }
 0x164   : > { %330 = vst.msk [vmem:[%s722_s2] sm:$0xff] %vm329_vm0, %v328_v3 }
 0x167   : > { %v335_v4 = vpop.xlane.xlu0 %334 }
 0x168   : > { %336 = vst.msk [vmem:[%s723_s3] sm:$0xff] %vm329_vm0, %v335_v4 }
 0x169 PF: > { %s17_s17 = sadd.s32 1, %s554_s17   ;;  %s729_s12 = smov %s538_s13 }
 0x16a   : > { %p14_p7 = scmp.ge.s32.totalorder %s17_s17, 4   ;;  %s730_s13 = smov %s542_s14 }
 0x16b   : > { %s731_s14 = smov %s631_s24  ;;  %s732_s15 = smov %s550_s16 }
 0x16c   : > { %s733_s16 = smov %s735_s19  ;;  %16 = sbr.rel (!%p14_p7) target bundleno = 4 (0x4), region = 80 }
 0x173   :  { %354 = vsyncpa [#allocation5], 1 }
 0x174   :  { %356 = vsyncpa [#allocation5 + $0x1], 1 }

</bundles_post_ra>
